<compile_context>
chip_gen: v6e
topology: v6e:2x2x1
jax: 0.10.0
libtpu: 0.0.40
codegen_flags: <defaults>
</compile_context>

<pallas_src>
import jax
import jax.numpy as jnp
from jax.experimental import pallas as pl
from jax.experimental.pallas import tpu as pltpu

_SCALE = 1.0 - 2.0 * 0.1  # 0.8
_SHIFT = 0.1
_LANE = 128


def _rescale_kernel(x_ref, o_ref):
    # Whole-tile elementwise affine on the VPU (trivially non-binding;
    # the kernel is HBM-bandwidth bound).
    o_ref[...] = (_SCALE * x_ref[...] + _SHIFT).astype(o_ref.dtype)


def _sublane_multiple(dtype) -> int:
    # Rows of the block must be a multiple of the packed sublane count:
    # 8 for 32-bit, 16 for 16-bit, 32 for 8-bit dtypes.
    itemsize = jnp.dtype(dtype).itemsize
    return max(8, 32 // itemsize)


def _round_up(x: int, m: int) -> int:
    return ((x + m - 1) // m) * m


def _cdiv(a: int, b: int) -> int:
    return -(-a // b)


def rescale(img: jax.Array) -> jax.Array:
    """out = 0.8*img + 0.1 elementwise via a Pallas TPU kernel (any shape, float dtype)."""
    orig_shape = img.shape
    dtype = img.dtype
    n = img.size

    rows = n // _LANE
    tail = n - rows * _LANE
    flat = img.reshape(-1)

    if rows == 0:
        # Input smaller than one lane row: not worth a kernel launch.
        return (_SCALE * img + _SHIFT).astype(dtype)

    main = flat[: rows * _LANE].reshape(rows, _LANE)

    sublane = _sublane_multiple(dtype)
    itemsize = jnp.dtype(dtype).itemsize

    # ~2 MiB per block (per the measured tiled-elementwise sweep: bigger
    # blocks amortize per-step overhead up to ~85-86% of HBM roofline).
    target_bytes = 2 * 1024 * 1024
    tm = max(sublane, target_bytes // (_LANE * itemsize))
    tm = _round_up(tm, sublane)

    # Don't allocate a block (and its double buffers) far bigger than the array.
    rows_padded = _round_up(rows, sublane)
    tm = min(tm, rows_padded)

    # Keep at least 2 parallel programs so both v7x TensorCores get work.
    if _cdiv(rows, tm) < 2 and rows_padded > sublane:
        tm = max(sublane, _round_up(_cdiv(rows, 2), sublane))

    grid = (_cdiv(rows, tm),)  # ragged last block handled by Pallas (elementwise-safe)

    out2d = pl.pallas_call(
        _rescale_kernel,
        out_shape=jax.ShapeDtypeStruct((rows, _LANE), dtype),
        grid_spec=pltpu.PrefetchScalarGridSpec(
            num_scalar_prefetch=0,
            grid=grid,
            in_specs=[pl.BlockSpec((tm, _LANE), lambda i: (i, 0))],
            out_specs=pl.BlockSpec((tm, _LANE), lambda i: (i, 0)),
        ),
        compiler_params=pltpu.CompilerParams(
            dimension_semantics=("parallel",),
        ),
    )(main)

    out_flat = out2d.reshape(-1)
    if tail:
        # Tiny (<128 elem) tail fixed up outside the kernel; avoids padding the
        # whole array (which would cost extra full HBM passes).
        tail_out = (_SCALE * flat[rows * _LANE :] + _SHIFT).astype(dtype)
        out_flat = jnp.concatenate([out_flat, tail_out])
    return out_flat.reshape(orig_shape)


if __name__ == "__main__":
    key = jax.random.PRNGKey(0)
    x = jax.random.uniform(key, (2, 4, 16, 16), dtype=jnp.float32)  # NCHW

    out = rescale(x)
    jax.block_until_ready(out)

    # Correctness check against the plain-JAX reference.
    ref = (1.0 - 2.0 * 0.1) * x + 0.1
    assert out.shape == x.shape and out.dtype == x.dtype
    assert jnp.allclose(out, ref, atol=1e-6), "mismatch vs reference"

    print("KERNEL_OK")
</pallas_src>

<mosaic_0001>
module attributes {stable_mosaic.version = 11 : i64} {
  func.func @_rescale_kernel(%arg0: i32, %arg1: memref<8x128xf32, #tpu.memory_space<vmem>>, %arg2: memref<8x128xf32, #tpu.memory_space<vmem>>) attributes {dimension_semantics = [#tpu.dimension_semantics<parallel>], iteration_bounds = array<i64: 2>, scalar_prefetch = 0 : i64, scratch_operands = 0 : i64, tpu.core_type = #tpu.core_type<tc>, window_params = [{transform_indices = @transform_0, window_bounds = array<i64: 8, 128>}, {transform_indices = @transform_1, window_bounds = array<i64: 8, 128>}]} {
    %c0 = arith.constant 0 : index
    %c0_0 = arith.constant 0 : index
    %0 = vector.load %arg1[%c0, %c0_0] : memref<8x128xf32, #tpu.memory_space<vmem>>, vector<8x128xf32>
    %cst = arith.constant 8.000000e-01 : f32
    %1 = vector.broadcast %cst : f32 to vector<8x128xf32>
    %2 = arith.mulf %1, %0 : vector<8x128xf32>
    %cst_1 = arith.constant 1.000000e-01 : f32
    %3 = vector.broadcast %cst_1 : f32 to vector<8x128xf32>
    %4 = arith.addf %2, %3 : vector<8x128xf32>
    %c0_2 = arith.constant 0 : index
    %c0_3 = arith.constant 0 : index
    %5 = vector.load %arg2[%c0_2, %c0_3] : memref<8x128xf32, #tpu.memory_space<vmem>>, vector<8x128xf32>
    tpu.vector_store %arg2[%c0_2, %c0_3], %4 {strides = array<i32>} : memref<8x128xf32, #tpu.memory_space<vmem>>, vector<8x128xf32>,
    return
  }
  func.func @transform_0(%arg0: i32) -> (i32, i32) {
    %c0_i32 = arith.constant 0 : i32
    %c0_i32_0 = arith.constant 0 : i32
    return %arg0, %c0_i32 : i32, i32
  }
  func.func @transform_1(%arg0: i32) -> (i32, i32) {
    %c0_i32 = arith.constant 0 : i32
    %c0_i32_0 = arith.constant 0 : i32
    return %arg0, %c0_i32 : i32, i32
  }
}

</mosaic_0001>

<bundles_post_ra>
// kernel: tpu_custom_call.1
= control target key start
LH: loop header
LB: loop body
LE: loop exit
PB: predicated region body
PF: predicated region fallthrough
CT: control target
= control target key end

     0   :  { %6 = vsyncpa [#allocation3], 0  ;;  %s525_s0 = inlined_call_operand.hbm [shape: f32[16,128], index: 0, kind: input, shape index: {}]   ;;  %s526_s1 = inlined_call_operand.hbm [shape: f32[16,128], index: 1, kind: output, shape index: {}]  }
   0x1   :  { %8 = vsyncpa [#allocation3 + $0x1], 0 }
   0x2   :  { %9 = vsyncpa [#allocation4], 0 }
   0x3   :  { %11 = vsyncpa [#allocation4 + $0x1], 0  ;;  %s384_s6 = smov 0   ;;  %s386_s7 = smov 0  }
   0x4   :  { %s388_s8 = smov 0   ;;  %s390_s9 = smov 0  }
   0x5 LB: > { %s405_s10 = sadd.s32 4294967295, %s370_s9   ;;  %s220_s11 = sadd.s32 4294967294, %s370_s9   ;;  %s370_s9 = sphi %s390_s9, %s543_s9   ;;  %s366_s8 = sphi %s388_s8, %s542_s8   ;;  %s362_s7 = sphi %s386_s7, %s541_s7   ;;  %s358_s6 = sphi %s384_s6, %s540_s6  }
   0x6   : > { %s409_s12 = sadd.s32 1, %s370_s9   ;;  %s24_s13 = sadd.s32 1, %s366_s8 }
   0x7   : > { %s21_s14 = ssub.s32 %s370_s9, %s409_s12  ;;  %p31_p0 = scmp.ne.s32.totalorder %s366_s8, %s362_s7 }
   0x8   : > { %p22_p1 = scmp.eq.s32.totalorder %s21_s14, 0  ;;  %p32_p2 = scmp.eq.s32.totalorder %s370_s9, 0 }
   0x9   : > { %p37_p3 = scmp.ne.s32.totalorder %s362_s7, %s358_s6  ;;  %p38_p4 = scmp.eq.s32.totalorder %s405_s10, 0 }
   0xa   : > { %s421_s15 = scalar_select %p22_p1, %s366_s8, %s24_s13  }
   0xb   : > { %p423_p5 = por %p32_p2, %p31_p0  ;;  %p427_p6 = por %p38_p4, %p37_p3 }
   0xc   : > { %p61_p7 = scmp.eq.s32.totalorder %s405_s10, 1  ;;  %p67_p8 = scmp.eq.s32.totalorder %s220_s11, 1 }
   0xd   : > { %s530_s17 = scalar_select %p427_p6, 1, 0 }
   0xe   : > { %p244_p10 = scmp.lt.s32.totalorder %s370_s9, 2  ;;  %p434_p11 = por %p61_p7, %p31_p0 }
   0xf   : > { %p438_p12 = por %p67_p8, %p37_p3  ;;  %s87_s20 = sand.u32 1, %s366_s8  }
  0x10   : > { %s531_s18 = scalar_select %p434_p11, 1, 0 }
  0x11   : > { %s532_s19 = scalar_select %p438_p12, 1, 0 }
  0x12   : > { %s224_s21 = sshll.u32 %s370_s9, 7  ;;  %s223_s22 = sshll.u32 %s87_s20, 3 }
  0x13   : > { %s447_s25 = scalar_lea.hbm %s525_s0, %s224_s21  ;;  %s91_s26 = scalar_lea.vmem [#allocation2], %s223_s22 }
  0x14   : > { %s98_s27 = sshll.u32 %s91_s26, 4  ;;  %p451_p13 = pnand %p244_p10, %p423_p5  ;;  %s455_s27 = int_to_ptr.vmem [resolvable:$true] %s98_s27 }
  0x15   : > { %s88_s29 = scalar_lea.sflag [#allocation3], %s87_s20  ;;  %s278_s30 = scalar_lea.hbm %s447_s25, 128 }
  0x16   : > { %p279_p2 = scmp.ne.s32.totalorder %s447_s25, %s278_s30  ;;  %p280_p3 = pneg %p451_p13 }
  0x17   : > { %s283_s4 = scalar_lea.hbm %s525_s0, 256  ;;  %p284_p5 = scmp.lt.s32.totalorder %s447_s25, %s525_s0 }
  0x18   : > { %p281_p4 = pnand %p280_p3, %p279_p2  ;;  %p285_p8 = scmp.lt.s32.totalorder %s283_s4, %s278_s30 }
  0x1a   : > { %p282_p7 = pneg %p281_p4  ;;  %p286_p10 = por %p285_p8, %p284_p5 }
  0x1c   : > { %p287_p9 = pnand %p286_p10, %p282_p7 }
  0x1e   : > { %290 = shalt.err (!%p287_p9)
}
  0x1f   : > { %s291_s13 = scalar_lea.vmem %s455_s27, 128  ;;  %s372_s14 = smov [#allocation2]  }
  0x20   : > { %p292_p0 = scmp.ne.s32.totalorder %s455_s27, %s291_s13  ;;  %s296_s16 = sshll.u32 %s372_s14, 4  ;;  %s297_s16 = int_to_ptr.vmem [resolvable:$false] %s296_s16 }
  0x21   : > { %s298_s20 = scalar_lea.vmem %s297_s16, 256  ;;  %p299_p4 = scmp.lt.s32.totalorder %s455_s27, %s297_s16 }
  0x22   : > { %p294_p1 = pnand %p292_p0, %p280_p3  ;;  %p300_p12 = scmp.lt.s32.totalorder %s298_s20, %s291_s13 }
  0x24   : > { %p295_p2 = pneg %p294_p1  ;;  %p301_p11 = por %p300_p12, %p299_p4 }
  0x26   : > { %p302_p6 = pnand %p301_p11, %p295_p2 }
  0x28   : > { %305 = shalt.err (!%p302_p6)
}
  0x29   : > { %239 = dma.hbm_to_vmem [thread:$0]  (!%p451_p13), %s447_s25, 128, %s455_s27, %s88_s29  }
  0x2a   : > { %p534_p9 = scmp.lt.s32.totalorder %s370_s9, 3  ;;  %p535_p7 = scmp.ge.s32.totalorder %s370_s9, 1 }
  0x2c   : > { %p104_p0 = pnand %p535_p7, %p534_p9 }
  0x2d   : > { %s482_s21 = sand.u32 (!%p104_p0), 1, %s362_s7   ;;  %p536_p6 = scmp.ne.s32.totalorder (!%p104_p0), %s530_s17, 0 }
  0x2e   : > { %107 = sbr.rel (%p104_p0) target bundleno = 77 (0x4d), region = 24  ;;  %s226_s22 = sshll.u32 (!%p104_p0), %s482_s21, 3 }
  0x2f   : > { %s110_s23 = scalar_lea.sflag (!%p104_p0), [#allocation3], %s482_s21  ;;  %s113_s24 = scalar_lea.vmem (!%p104_p0), [#allocation2], %s226_s22 }
  0x33   : > { %349 = dma.done.wait (%p536_p6), %s110_s23, 128  }
  0x34   : > { %351 = vsyncadd (%p536_p6), %s110_s23, 4294967168  ;;  %v132_v0 = vld [vmem:[%s113_s24] sm:$0xff]  ;;  %s131_s25 = scalar_lea.vmem [#allocation5], %s226_s22  ;;  %s229_s27 = sshll.u32 %s405_s10, 7 }
  0x35   : > { %s150_s26 = sshll.u32 %s131_s25, 4  ;;  %v133_v1 = vmul.f32 0.8, %v132_v0  ;;  %s148_s30 = scalar_lea.hbm %s526_s1, %s229_s27  ;;  %s151_s26 = int_to_ptr.vmem [resolvable:$true] %s150_s26 }
  0x36   : > { %s137_s2 = scalar_lea.sflag [#allocation4], %s482_s21  ;;  %s306_s3 = scalar_lea.vmem %s151_s26, 128 }
  0x37   : > { %v134_v2 = vadd.f32 0.1, %v133_v1  ;;  %p307_p11 = scmp.ne.s32.totalorder %s151_s26, %s306_s3  ;;  %p537_p12 = scmp.ne.s32.totalorder %s531_s18, 0 }
  0x38   : > { %s373_s17 = smov [#allocation5]  }
  0x39   : > { %135 = vst [vmem:[%s131_s25] sm:$0xff] %v134_v2  ;;  %p308_p13 = pnand %p307_p11, %p537_p12  ;;  %s310_s4 = sshll.u32 %s373_s17, 4  ;;  %s311_s4 = int_to_ptr.vmem [resolvable:$false] %s310_s4 }
  0x3a   : > { %s312_s5 = scalar_lea.vmem %s311_s4, 256  ;;  %p313_p3 = scmp.lt.s32.totalorder %s151_s26, %s311_s4 }
  0x3b   : > { %p309_p1 = pneg %p308_p13  ;;  %p314_p5 = scmp.lt.s32.totalorder %s312_s5, %s306_s3 }
  0x3d   : > { %p315_p8 = por %p314_p5, %p313_p3 }
  0x3f   : > { %p316_p10 = pnand %p315_p8, %p309_p1 }
  0x41   : > { %319 = shalt.err (!%p316_p10)
}
  0x42   : > { %s320_s10 = scalar_lea.hbm %s148_s30, 128  ;;  %s324_s14 = scalar_lea.hbm %s526_s1, 256 }
  0x43   : > { %p321_p2 = scmp.ne.s32.totalorder %s148_s30, %s320_s10  ;;  %p325_p7 = scmp.lt.s32.totalorder %s148_s30, %s526_s1 }
  0x44   : > { %p326_p0 = scmp.lt.s32.totalorder %s324_s14, %s320_s10 }
  0x45   : > { %p322_p4 = pnand %p321_p2, %p537_p12 }
  0x46   : > { %p327_p6 = por %p326_p0, %p325_p7 }
  0x47   : > { %p323_p9 = pneg %p322_p4 }
  0x49   : > { %p328_p11 = pnand %p327_p6, %p323_p9 }
  0x4b   : > { %331 = shalt.err (!%p328_p11)
}
  0x4c   : > { %234 = dma.vmem_to_hbm [thread:$0]  (%p537_p12), %s151_s26, 128, %s148_s30, %s137_s2  }
  0x4d PF: > { %s162_s21 = sand.u32 1, %s358_s6   ;;  %p538_p13 = scmp.ne.s32.totalorder %s532_s19, 0 }
  0x4e   : > { %p539_p1 = scmp.ge.s32.totalorder %s370_s9, 2  ;;  %s163_s22 = scalar_lea.sflag [#allocation4], %s162_s21 }
  0x50   : > { %p241_p3 = pnand %p539_p1, %p538_p13 }
  0x52   : > { %p242_p5 = pneg %p241_p3 }
  0x54   : > { %353 = dma.done.wait (%p242_p5), %s163_s22, 128  }
  0x55   : > { %355 = vsyncadd (%p242_p5), %s163_s22, 4294967168  ;;  %p14_p8 = scmp.ge.s32.totalorder %s409_s12, 4   ;;  %s540_s6 = smov %s362_s7 }
  0x56   : > { %s541_s7 = smov %s366_s8  ;;  %s542_s8 = smov %s421_s15 }
  0x57   : > { %s543_s9 = smov %s409_s12  ;;  %16 = sbr.rel (!%p14_p8) target bundleno = 5 (0x5), region = 69 }
  0x5c   :  { %168 = vsyncpa [#allocation3], 1 }
  0x5d   :  { %170 = vsyncpa [#allocation3 + $0x1], 1 }
  0x5e   :  { %171 = vsyncpa [#allocation4], 1 }
  0x5f   :  { %173 = vsyncpa [#allocation4 + $0x1], 1 }

</bundles_post_ra>
